<compile_context>
chip_gen: v5e
topology: v5e:2x2
jax: 0.10.0
libtpu: 0.0.40
codegen_flags: <defaults>
</compile_context>

<pallas_src>
import functools

import jax
import jax.numpy as jnp
from jax import lax
from jax.experimental import pallas as pl
from jax.experimental.pallas import tpu as pltpu

SCENE_WEIGHT = 3.0
DEPTH_WEIGHT = 3.0
NORMALS_WEIGHT = 30.0


def _multitask_pixel_kernel(depth_pred_ref, depth_gt_ref,
                            npred_ref, ngt_ref, mask_ref,
                            huber_out, norm_out, mask_out,
                            *, r_tile, rows_pad, has_tail):
    j = pl.program_id(1)

    @pl.when(j == 0)
    def _init():
        huber_out[...] = jnp.zeros_like(huber_out)
        norm_out[...] = jnp.zeros_like(norm_out)
        mask_out[...] = jnp.zeros_like(mask_out)

    # ---- Depth: SmoothL1 (beta=1) against log(clamp(gt, 1e-3, 10)).
    dp = depth_pred_ref[0].astype(jnp.float32)            # (r_tile, 128)
    dg = depth_gt_ref[0].astype(jnp.float32)
    log_t = jnp.log(jnp.clip(dg, 0.001, 10.0))
    d = dp - log_t
    ad = jnp.abs(d)
    hub = jnp.where(ad < 1.0, 0.5 * d * d, ad - 0.5)

    # ---- Surface normals.  With xn = pn / clamp(||pn||, 1e-5):
    #        (1 - <xn,gn>) + ||xn - gn||^2 == 1 + ||xn||^2 + ||gn||^2 - 3<xn,gn>
    #      so xn is never materialized; channel reductions over the leading
    #      (non-layout) axis are plain VPU adds, normalization is one EUP rsqrt.
    pn = npred_ref[...].astype(jnp.float32)                # (3, r_tile, 128)
    gn = ngt_ref[...].astype(jnp.float32)
    m = mask_ref[0].astype(jnp.float32)                    # (r_tile, 128)
    ss = jnp.sum(pn * pn, axis=0)
    pg = jnp.sum(pn * gn, axis=0)
    gg = jnp.sum(gn * gn, axis=0)
    inv = lax.rsqrt(jnp.maximum(ss, 1e-10))                # == 1/clamp(||pn||,1e-5)
    nrm = (1.0 + ss * inv * inv + gg - 3.0 * (pg * inv)) * m

    if has_tail:
        # Ragged last tile: rows >= rows_pad were never DMA'd (undefined
        # contents) -- select (not multiply) so stale NaN/Inf cannot leak in.
        row = j * r_tile + lax.broadcasted_iota(jnp.int32, hub.shape, 0)
        valid = row < rows_pad
        hub = jnp.where(valid, hub, 0.0)
        nrm = jnp.where(valid, nrm, 0.0)
        m = jnp.where(valid, m, 0.0)

    # Fold (r_tile,128) -> vreg-shaped (8,128) partials (layout-preserving
    # reshape + VPU adds) and accumulate into the resident output blocks.
    def _fold(x):
        return jnp.sum(x.reshape(r_tile // 8, 8, 128), axis=0)

    huber_out[...] += _fold(hub)
    norm_out[...] += _fold(nrm)
    mask_out[...] += _fold(m)


def _default_row_cap():
    """Largest row tile (sublane count) that is safe for this generation.

    Working set: 9 f32 streams x r_tile x 128 x 4 B x 2 pipeline buffers
    ~= 9.2 KiB per row, so 1024 rows ~= 9.4 MiB (safe on v7x's 64 MiB VMEM)
    and 2048 rows ~= 18.9 MiB (fine on v5e/v6e's 128 MiB).
    """
    try:
        vmem_bytes = pltpu.get_tpu_info().vmem_capacity_bytes
    except Exception:
        vmem_bytes = 64 * 1024 * 1024          # assume the tightest (v7x)
    return 2048 if vmem_bytes >= 96 * 1024 * 1024 else 1024


def _choose_tiling(hw, row_cap):
    """Lane-dense (rows, 128) factorization of HW plus a large legal row tile."""
    lane = 128
    rows = pl.cdiv(hw, lane)
    rows_pad = pl.cdiv(rows, 8) * 8            # sublane-aligned row count
    # Prefer an exact divisor (no ragged tail) when a reasonably big one exists.
    best, t = 0, 8
    while t <= min(rows_pad, row_cap):
        if rows_pad % t == 0:
            best = t
        t += 8
    if best >= min(rows_pad, 256):
        r_tile = best
        n_j = rows_pad // r_tile
        has_tail = False
    else:                                      # awkward rows: cdiv grid + masked tail
        r_tile = min(row_cap, rows_pad)
        n_j = pl.cdiv(rows_pad, r_tile)
        has_tail = (n_j * r_tile) != rows_pad
    return lane, rows_pad, r_tile, n_j, has_tail


def multitask_loss(sample, row_cap=None):
    scene_pred = sample["scene_pred"].astype(jnp.float32)        # (N, C) log-probs
    scene_gt = sample["scene_gt"].astype(jnp.int32)              # (N,)
    depth_pred = sample["depth_pred"]                            # (N, 1, H, W)
    depth_gt = sample["depth_gt"]
    npred = sample["normals_pred"]                               # (N, 3, H, W)
    ngt = sample["normals_gt"]
    mask = sample["normals_mask"]                                # (N, 1, H, W)

    n = scene_pred.shape[0]
    _, _, h, w = depth_pred.shape
    hw = h * w

    if row_cap is None:
        row_cap = _default_row_cap()
    lane, rows_pad, r_tile, n_j, has_tail = _choose_tiling(hw, row_cap)
    hw_pad = rows_pad * lane

    # Free (contiguous) reshapes when HW is already lane-dense; otherwise pad
    # once with constants chosen so padded pixels contribute exactly zero
    # (depth: pred=0 vs log(clip(1))=0; normals/mask: 0).  No dtype casts here:
    # each input is read from HBM exactly once (bf16 inputs stay bf16 in HBM).
    def _prep(x, c, pad_value):
        x = x.reshape(n, c, hw)
        if hw_pad != hw:
            x = jnp.pad(x, ((0, 0), (0, 0), (0, hw_pad - hw)),
                        constant_values=pad_value)
        return x.reshape(n, c, rows_pad, lane)

    dp = _prep(depth_pred, 1, 0)
    dg = _prep(depth_gt, 1, 1)
    pn = _prep(npred, 3, 0)
    gn = _prep(ngt, 3, 0)
    mk = _prep(mask, 1, 0)

    pix_map = lambda i, j: (i, 0, j, 0)
    out_map = lambda i, j: (i, 0, 0)

    kernel = functools.partial(_multitask_pixel_kernel,
                               r_tile=r_tile, rows_pad=rows_pad,
                               has_tail=has_tail)

    huber_p, norm_p, mask_p = pl.pallas_call(
        kernel,
        out_shape=(jax.ShapeDtypeStruct((n, 8, lane), jnp.float32),) * 3,
        grid=(n, n_j),
        in_specs=[
            pl.BlockSpec((None, 1, r_tile, lane), pix_map),   # depth_pred
            pl.BlockSpec((None, 1, r_tile, lane), pix_map),   # depth_gt
            pl.BlockSpec((None, 3, r_tile, lane), pix_map),   # normals_pred
            pl.BlockSpec((None, 3, r_tile, lane), pix_map),   # normals_gt
            pl.BlockSpec((None, 1, r_tile, lane), pix_map),   # normals_mask
        ],
        out_specs=(
            pl.BlockSpec((None, 8, lane), out_map),           # per-batch huber partial
            pl.BlockSpec((None, 8, lane), out_map),           # per-batch normals partial
            pl.BlockSpec((None, 8, lane), out_map),           # per-batch mask partial
        ),
        compiler_params=pltpu.CompilerParams(
            dimension_semantics=("parallel", "arbitrary"),
            vmem_limit_bytes=48 * 1024 * 1024),
    )(dp, dg, pn, gn, mk)

    # Tiny O(N*C) scene NLL + final weighted combine in plain JAX.
    scene_loss = -jnp.mean(scene_pred[jnp.arange(n), scene_gt])
    depth_loss = jnp.sum(huber_p) / float(n * hw)
    # NOTE: NaN if normals_mask is all zero -- identical to the reference.
    normals_loss = jnp.sum(norm_p) / jnp.sum(mask_p)
    return (SCENE_WEIGHT * scene_loss
            + DEPTH_WEIGHT * depth_loss
            + NORMALS_WEIGHT * normals_loss)


def _reference_loss(sample):
    """Pure-JAX reference matching the PyTorch MultiTaskLoss forward."""
    sp = sample["scene_pred"].astype(jnp.float32)
    gt = sample["scene_gt"].astype(jnp.int32)
    scene_loss = -jnp.mean(sp[jnp.arange(sp.shape[0]), gt])

    dp = sample["depth_pred"].astype(jnp.float32)
    dg = sample["depth_gt"].astype(jnp.float32)
    log_t = jnp.log(jnp.clip(dg, 0.001, 10.0))
    d = dp - log_t
    ad = jnp.abs(d)
    depth_loss = jnp.mean(jnp.where(ad < 1.0, 0.5 * d * d, ad - 0.5))

    x = sample["normals_pred"].astype(jnp.float32)
    t = sample["normals_gt"].astype(jnp.float32)
    m = sample["normals_mask"].astype(jnp.float32)
    norm = jnp.maximum(jnp.linalg.norm(x, axis=1, keepdims=True), 1e-5)
    xn = x / norm
    dot = -jnp.sum(xn * t, axis=1) + 1.0
    l2 = jnp.sum((xn - t) ** 2, axis=1)
    loss = (dot + l2) * jnp.squeeze(m, axis=1)
    normals_loss = jnp.sum(loss) / jnp.sum(m)

    return (SCENE_WEIGHT * scene_loss
            + DEPTH_WEIGHT * depth_loss
            + NORMALS_WEIGHT * normals_loss)


def _make_sample(n, num_scenes, h, w, key):
    k = jax.random.split(key, 7)
    scene_logits = jax.random.normal(k[0], (n, num_scenes), jnp.float32)
    scene_pred = jax.nn.log_softmax(scene_logits, axis=-1)
    scene_gt = jax.random.randint(k[1], (n,), 0, num_scenes, jnp.int32)
    depth_pred = jax.random.normal(k[2], (n, 1, h, w), jnp.float32)
    depth_gt = jax.random.uniform(k[3], (n, 1, h, w), jnp.float32, 0.0, 12.0)
    normals_pred = jax.random.normal(k[4], (n, 3, h, w), jnp.float32)
    ngt_raw = jax.random.normal(k[5], (n, 3, h, w), jnp.float32)
    normals_gt = ngt_raw / jnp.maximum(
        jnp.linalg.norm(ngt_raw, axis=1, keepdims=True), 1e-5)
    normals_mask = (jax.random.uniform(k[6], (n, 1, h, w)) > 0.3).astype(jnp.float32)
    return {
        "scene_pred": scene_pred,
        "scene_gt": scene_gt,
        "depth_pred": depth_pred,
        "depth_gt": depth_gt,
        "normals_pred": normals_pred,
        "normals_gt": normals_gt,
        "normals_mask": normals_mask,
    }


if __name__ == "__main__":
    # 1) Small canonical case (exact-divisor tiling, padded odd HW).
    sample = _make_sample(2, 8, 16, 16, jax.random.PRNGKey(0))
    out = jax.block_until_ready(multitask_loss(sample))
    ref = jax.block_until_ready(_reference_loss(sample))
    assert jnp.allclose(out, ref, atol=1e-4, rtol=1e-4), (out, ref)

    # 2) Force the cdiv-grid ragged-tail path (rows_pad=24, r_tile=16 -> 2 steps,
    #    last one partially out of bounds and masked in-kernel).
    sample2 = _make_sample(2, 8, 16, 192, jax.random.PRNGKey(1))
    out2 = jax.block_until_ready(multitask_loss(sample2, row_cap=16))
    ref2 = jax.block_until_ready(_reference_loss(sample2))
    assert jnp.allclose(out2, ref2, atol=1e-4, rtol=1e-4), (out2, ref2)

    print("KERNEL_OK")
</pallas_src>

<mosaic_0001>
module attributes {stable_mosaic.version = 11 : i64} {
  func.func @_multitask_pixel_kernel(%arg0: i32, %arg1: i32, %arg2: memref<1x1x8x128xf32, #tpu.memory_space<vmem>>, %arg3: memref<1x1x8x128xf32, #tpu.memory_space<vmem>>, %arg4: memref<1x3x8x128xf32, #tpu.memory_space<vmem>>, %arg5: memref<1x3x8x128xf32, #tpu.memory_space<vmem>>, %arg6: memref<1x1x8x128xf32, #tpu.memory_space<vmem>>, %arg7: memref<1x8x128xf32, #tpu.memory_space<vmem>>, %arg8: memref<1x8x128xf32, #tpu.memory_space<vmem>>, %arg9: memref<1x8x128xf32, #tpu.memory_space<vmem>>) attributes {dimension_semantics = [#tpu.dimension_semantics<parallel>, #tpu.dimension_semantics<arbitrary>], iteration_bounds = array<i64: 2, 1>, scalar_prefetch = 0 : i64, scratch_operands = 0 : i64, tpu.core_type = #tpu.core_type<tc>, window_params = [{transform_indices = @transform_0, window_bounds = array<i64: 1, 1, 8, 128>}, {transform_indices = @transform_1, window_bounds = array<i64: 1, 1, 8, 128>}, {transform_indices = @transform_2, window_bounds = array<i64: 1, 3, 8, 128>}, {transform_indices = @transform_3, window_bounds = array<i64: 1, 3, 8, 128>}, {transform_indices = @transform_4, window_bounds = array<i64: 1, 1, 8, 128>}, {transform_indices = @transform_5, window_bounds = array<i64: 1, 8, 128>}, {transform_indices = @transform_6, window_bounds = array<i64: 1, 8, 128>}, {transform_indices = @transform_7, window_bounds = array<i64: 1, 8, 128>}]} {
    %c0_i32 = arith.constant 0 : i32
    %0 = arith.cmpi eq, %arg1, %c0_i32 : i32
    %1 = arith.extui %0 : i1 to i32
    %c0_i32_0 = arith.constant 0 : i32
    %2 = arith.cmpi ne, %1, %c0_i32_0 : i32
    scf.if %2 {
      %cst_51 = arith.constant 0.000000e+00 : f32
      %71 = vector.broadcast %cst_51 : f32 to vector<8x128xf32>
      %c0_52 = arith.constant 0 : index
      %c0_53 = arith.constant 0 : index
      %c0_54 = arith.constant 0 : index
      %72 = vector.load %arg7[%c0_52, %c0_53, %c0_54] : memref<1x8x128xf32, #tpu.memory_space<vmem>>, vector<1x8x128xf32>
      %73 = vector.shape_cast %72 : vector<1x8x128xf32> to vector<8x128xf32>
      %74 = vector.shape_cast %71 : vector<8x128xf32> to vector<1x8x128xf32>
      tpu.vector_store %arg7[%c0_52, %c0_53, %c0_54], %74 {strides = array<i32>} : memref<1x8x128xf32, #tpu.memory_space<vmem>>, vector<1x8x128xf32>,
      %cst_55 = arith.constant 0.000000e+00 : f32
      %75 = vector.broadcast %cst_55 : f32 to vector<8x128xf32>
      %c0_56 = arith.constant 0 : index
      %c0_57 = arith.constant 0 : index
      %c0_58 = arith.constant 0 : index
      %76 = vector.load %arg8[%c0_56, %c0_57, %c0_58] : memref<1x8x128xf32, #tpu.memory_space<vmem>>, vector<1x8x128xf32>
      %77 = vector.shape_cast %76 : vector<1x8x128xf32> to vector<8x128xf32>
      %78 = vector.shape_cast %75 : vector<8x128xf32> to vector<1x8x128xf32>
      tpu.vector_store %arg8[%c0_56, %c0_57, %c0_58], %78 {strides = array<i32>} : memref<1x8x128xf32, #tpu.memory_space<vmem>>, vector<1x8x128xf32>,
      %cst_59 = arith.constant 0.000000e+00 : f32
      %79 = vector.broadcast %cst_59 : f32 to vector<8x128xf32>
      %c0_60 = arith.constant 0 : index
      %c0_61 = arith.constant 0 : index
      %c0_62 = arith.constant 0 : index
      %80 = vector.load %arg9[%c0_60, %c0_61, %c0_62] : memref<1x8x128xf32, #tpu.memory_space<vmem>>, vector<1x8x128xf32>
      %81 = vector.shape_cast %80 : vector<1x8x128xf32> to vector<8x128xf32>
      %82 = vector.shape_cast %79 : vector<8x128xf32> to vector<1x8x128xf32>
      tpu.vector_store %arg9[%c0_60, %c0_61, %c0_62], %82 {strides = array<i32>} : memref<1x8x128xf32, #tpu.memory_space<vmem>>, vector<1x8x128xf32>,
    } else {
    }
    %c0 = arith.constant 0 : index
    %c0_1 = arith.constant 0 : index
    %c0_2 = arith.constant 0 : index
    %c0_3 = arith.constant 0 : index
    %3 = vector.load %arg2[%c0, %c0_1, %c0_2, %c0_3] : memref<1x1x8x128xf32, #tpu.memory_space<vmem>>, vector<1x1x8x128xf32>
    %4 = vector.shape_cast %3 : vector<1x1x8x128xf32> to vector<8x128xf32>
    %c0_4 = arith.constant 0 : index
    %c0_5 = arith.constant 0 : index
    %c0_6 = arith.constant 0 : index
    %c0_7 = arith.constant 0 : index
    %5 = vector.load %arg3[%c0_4, %c0_5, %c0_6, %c0_7] : memref<1x1x8x128xf32, #tpu.memory_space<vmem>>, vector<1x1x8x128xf32>
    %6 = vector.shape_cast %5 : vector<1x1x8x128xf32> to vector<8x128xf32>
    %cst = arith.constant 1.000000e-03 : f32
    %cst_8 = arith.constant 1.000000e+01 : f32
    %7 = vector.broadcast %cst : f32 to vector<8x128xf32>
    %8 = arith.maximumf %7, %6 : vector<8x128xf32>
    %9 = vector.broadcast %cst_8 : f32 to vector<8x128xf32>
    %10 = arith.minimumf %9, %8 : vector<8x128xf32>
    %11 = math.log %10 : vector<8x128xf32>
    %12 = arith.subf %4, %11 : vector<8x128xf32>
    %13 = math.absf %12 : vector<8x128xf32>
    %cst_9 = arith.constant 1.000000e+00 : f32
    %14 = vector.broadcast %cst_9 : f32 to vector<8x128xf32>
    %15 = arith.cmpf olt, %13, %14 : vector<8x128xf32>
    %cst_10 = arith.constant 5.000000e-01 : f32
    %16 = vector.broadcast %cst_10 : f32 to vector<8x128xf32>
    %17 = arith.mulf %16, %12 : vector<8x128xf32>
    %18 = arith.mulf %17, %12 : vector<8x128xf32>
    %cst_11 = arith.constant 5.000000e-01 : f32
    %19 = vector.broadcast %cst_11 : f32 to vector<8x128xf32>
    %20 = arith.subf %13, %19 : vector<8x128xf32>
    %21 = arith.select %15, %18, %20 : vector<8x128xi1>, vector<8x128xf32>
    %c0_12 = arith.constant 0 : index
    %c0_13 = arith.constant 0 : index
    %c0_14 = arith.constant 0 : index
    %c0_15 = arith.constant 0 : index
    %22 = vector.load %arg4[%c0_12, %c0_13, %c0_14, %c0_15] : memref<1x3x8x128xf32, #tpu.memory_space<vmem>>, vector<1x3x8x128xf32>
    %23 = vector.shape_cast %22 : vector<1x3x8x128xf32> to vector<3x8x128xf32>
    %c0_16 = arith.constant 0 : index
    %c0_17 = arith.constant 0 : index
    %c0_18 = arith.constant 0 : index
    %c0_19 = arith.constant 0 : index
    %24 = vector.load %arg5[%c0_16, %c0_17, %c0_18, %c0_19] : memref<1x3x8x128xf32, #tpu.memory_space<vmem>>, vector<1x3x8x128xf32>
    %25 = vector.shape_cast %24 : vector<1x3x8x128xf32> to vector<3x8x128xf32>
    %c0_20 = arith.constant 0 : index
    %c0_21 = arith.constant 0 : index
    %c0_22 = arith.constant 0 : index
    %c0_23 = arith.constant 0 : index
    %26 = vector.load %arg6[%c0_20, %c0_21, %c0_22, %c0_23] : memref<1x1x8x128xf32, #tpu.memory_space<vmem>>, vector<1x1x8x128xf32>
    %27 = vector.shape_cast %26 : vector<1x1x8x128xf32> to vector<8x128xf32>
    %28 = arith.mulf %23, %23 : vector<3x8x128xf32>
    %cst_24 = arith.constant dense<0.000000e+00> : vector<8x128xf32>
    %29 = vector.multi_reduction <add>, %28, %cst_24 [0] : vector<3x8x128xf32> to vector<8x128xf32>
    %30 = arith.mulf %23, %25 : vector<3x8x128xf32>
    %cst_25 = arith.constant dense<0.000000e+00> : vector<8x128xf32>
    %31 = vector.multi_reduction <add>, %30, %cst_25 [0] : vector<3x8x128xf32> to vector<8x128xf32>
    %32 = arith.mulf %25, %25 : vector<3x8x128xf32>
    %cst_26 = arith.constant dense<0.000000e+00> : vector<8x128xf32>
    %33 = vector.multi_reduction <add>, %32, %cst_26 [0] : vector<3x8x128xf32> to vector<8x128xf32>
    %cst_27 = arith.constant 1.000000e-10 : f32
    %34 = vector.broadcast %cst_27 : f32 to vector<8x128xf32>
    %35 = arith.maximumf %29, %34 : vector<8x128xf32>
    %36 = math.rsqrt %35 : vector<8x128xf32>
    %37 = arith.mulf %29, %36 : vector<8x128xf32>
    %38 = arith.mulf %37, %36 : vector<8x128xf32>
    %cst_28 = arith.constant 1.000000e+00 : f32
    %39 = vector.broadcast %cst_28 : f32 to vector<8x128xf32>
    %40 = arith.addf %39, %38 : vector<8x128xf32>
    %41 = arith.addf %40, %33 : vector<8x128xf32>
    %42 = arith.mulf %31, %36 : vector<8x128xf32>
    %cst_29 = arith.constant 3.000000e+00 : f32
    %43 = vector.broadcast %cst_29 : f32 to vector<8x128xf32>
    %44 = arith.mulf %43, %42 : vector<8x128xf32>
    %45 = arith.subf %41, %44 : vector<8x128xf32>
    %46 = arith.mulf %45, %27 : vector<8x128xf32>
    %c0_30 = arith.constant 0 : index
    %c0_31 = arith.constant 0 : index
    %c0_32 = arith.constant 0 : index
    %47 = vector.load %arg7[%c0_30, %c0_31, %c0_32] : memref<1x8x128xf32, #tpu.memory_space<vmem>>, vector<1x8x128xf32>
    %48 = vector.shape_cast %47 : vector<1x8x128xf32> to vector<8x128xf32>
    %49 = vector.shape_cast %21 : vector<8x128xf32> to vector<1x8x128xf32>
    %cst_33 = arith.constant dense<0.000000e+00> : vector<8x128xf32>
    %50 = vector.multi_reduction <add>, %49, %cst_33 [0] : vector<1x8x128xf32> to vector<8x128xf32>
    %51 = arith.addf %48, %50 : vector<8x128xf32>
    %c0_34 = arith.constant 0 : index
    %c0_35 = arith.constant 0 : index
    %c0_36 = arith.constant 0 : index
    %52 = vector.load %arg7[%c0_34, %c0_35, %c0_36] : memref<1x8x128xf32, #tpu.memory_space<vmem>>, vector<1x8x128xf32>
    %53 = vector.shape_cast %52 : vector<1x8x128xf32> to vector<8x128xf32>
    %54 = vector.shape_cast %51 : vector<8x128xf32> to vector<1x8x128xf32>
    tpu.vector_store %arg7[%c0_34, %c0_35, %c0_36], %54 {strides = array<i32>} : memref<1x8x128xf32, #tpu.memory_space<vmem>>, vector<1x8x128xf32>,
    %c0_37 = arith.constant 0 : index
    %c0_38 = arith.constant 0 : index
    %c0_39 = arith.constant 0 : index
    %55 = vector.load %arg8[%c0_37, %c0_38, %c0_39] : memref<1x8x128xf32, #tpu.memory_space<vmem>>, vector<1x8x128xf32>
    %56 = vector.shape_cast %55 : vector<1x8x128xf32> to vector<8x128xf32>
    %57 = vector.shape_cast %46 : vector<8x128xf32> to vector<1x8x128xf32>
    %cst_40 = arith.constant dense<0.000000e+00> : vector<8x128xf32>
    %58 = vector.multi_reduction <add>, %57, %cst_40 [0] : vector<1x8x128xf32> to vector<8x128xf32>
    %59 = arith.addf %56, %58 : vector<8x128xf32>
    %c0_41 = arith.constant 0 : index
    %c0_42 = arith.constant 0 : index
    %c0_43 = arith.constant 0 : index
    %60 = vector.load %arg8[%c0_41, %c0_42, %c0_43] : memref<1x8x128xf32, #tpu.memory_space<vmem>>, vector<1x8x128xf32>
    %61 = vector.shape_cast %60 : vector<1x8x128xf32> to vector<8x128xf32>
    %62 = vector.shape_cast %59 : vector<8x128xf32> to vector<1x8x128xf32>
    tpu.vector_store %arg8[%c0_41, %c0_42, %c0_43], %62 {strides = array<i32>} : memref<1x8x128xf32, #tpu.memory_space<vmem>>, vector<1x8x128xf32>,
    %c0_44 = arith.constant 0 : index
    %c0_45 = arith.constant 0 : index
    %c0_46 = arith.constant 0 : index
    %63 = vector.load %arg9[%c0_44, %c0_45, %c0_46] : memref<1x8x128xf32, #tpu.memory_space<vmem>>, vector<1x8x128xf32>
    %64 = vector.shape_cast %63 : vector<1x8x128xf32> to vector<8x128xf32>
    %65 = vector.shape_cast %27 : vector<8x128xf32> to vector<1x8x128xf32>
    %cst_47 = arith.constant dense<0.000000e+00> : vector<8x128xf32>
    %66 = vector.multi_reduction <add>, %65, %cst_47 [0] : vector<1x8x128xf32> to vector<8x128xf32>
    %67 = arith.addf %64, %66 : vector<8x128xf32>
    %c0_48 = arith.constant 0 : index
    %c0_49 = arith.constant 0 : index
    %c0_50 = arith.constant 0 : index
    %68 = vector.load %arg9[%c0_48, %c0_49, %c0_50] : memref<1x8x128xf32, #tpu.memory_space<vmem>>, vector<1x8x128xf32>
    %69 = vector.shape_cast %68 : vector<1x8x128xf32> to vector<8x128xf32>
    %70 = vector.shape_cast %67 : vector<8x128xf32> to vector<1x8x128xf32>
    tpu.vector_store %arg9[%c0_48, %c0_49, %c0_50], %70 {strides = array<i32>} : memref<1x8x128xf32, #tpu.memory_space<vmem>>, vector<1x8x128xf32>,
    return
  }
  func.func @transform_0(%arg0: i32, %arg1: i32) -> (i32, i32, i32, i32) {
    %c0_i32 = arith.constant 0 : i32
    %c0_i32_0 = arith.constant 0 : i32
    %c0_i32_1 = arith.constant 0 : i32
    return %arg0, %c0_i32, %arg1, %c0_i32_0 : i32, i32, i32, i32
  }
  func.func @transform_1(%arg0: i32, %arg1: i32) -> (i32, i32, i32, i32) {
    %c0_i32 = arith.constant 0 : i32
    %c0_i32_0 = arith.constant 0 : i32
    %c0_i32_1 = arith.constant 0 : i32
    return %arg0, %c0_i32, %arg1, %c0_i32_0 : i32, i32, i32, i32
  }
  func.func @transform_2(%arg0: i32, %arg1: i32) -> (i32, i32, i32, i32) {
    %c0_i32 = arith.constant 0 : i32
    %c0_i32_0 = arith.constant 0 : i32
    %c0_i32_1 = arith.constant 0 : i32
    return %arg0, %c0_i32, %arg1, %c0_i32_0 : i32, i32, i32, i32
  }
  func.func @transform_3(%arg0: i32, %arg1: i32) -> (i32, i32, i32, i32) {
    %c0_i32 = arith.constant 0 : i32
    %c0_i32_0 = arith.constant 0 : i32
    %c0_i32_1 = arith.constant 0 : i32
    return %arg0, %c0_i32, %arg1, %c0_i32_0 : i32, i32, i32, i32
  }
  func.func @transform_4(%arg0: i32, %arg1: i32) -> (i32, i32, i32, i32) {
    %c0_i32 = arith.constant 0 : i32
    %c0_i32_0 = arith.constant 0 : i32
    %c0_i32_1 = arith.constant 0 : i32
    return %arg0, %c0_i32, %arg1, %c0_i32_0 : i32, i32, i32, i32
  }
  func.func @transform_5(%arg0: i32, %arg1: i32) -> (i32, i32, i32) {
    %c0_i32 = arith.constant 0 : i32
    %c0_i32_0 = arith.constant 0 : i32
    %c0_i32_1 = arith.constant 0 : i32
    return %arg0, %c0_i32, %c0_i32_0 : i32, i32, i32
  }
  func.func @transform_6(%arg0: i32, %arg1: i32) -> (i32, i32, i32) {
    %c0_i32 = arith.constant 0 : i32
    %c0_i32_0 = arith.constant 0 : i32
    %c0_i32_1 = arith.constant 0 : i32
    return %arg0, %c0_i32, %c0_i32_0 : i32, i32, i32
  }
  func.func @transform_7(%arg0: i32, %arg1: i32) -> (i32, i32, i32) {
    %c0_i32 = arith.constant 0 : i32
    %c0_i32_0 = arith.constant 0 : i32
    %c0_i32_1 = arith.constant 0 : i32
    return %arg0, %c0_i32, %c0_i32_0 : i32, i32, i32
  }
}

</mosaic_0001>

<bundles_post_ra>
// kernel: tpu_custom_call.1
= control target key start
LH: loop header
LB: loop body
LE: loop exit
PB: predicated region body
PF: predicated region fallthrough
CT: control target
= control target key end

     0   :  { %s1607_s0 = inlined_call_operand.hbm [shape: f32[2,1,8,128], index: 0, kind: input, shape index: {}]   ;;  %s1608_s1 = inlined_call_operand.hbm [shape: f32[2,1,8,128], index: 1, kind: input, shape index: {}]   ;;  %s1609_s2 = inlined_call_operand.hbm [shape: f32[2,3,8,128], index: 2, kind: input, shape index: {}]   ;;  %s1610_s3 = inlined_call_operand.hbm [shape: f32[2,3,8,128], index: 3, kind: input, shape index: {}]   ;;  %s1611_s4 = inlined_call_operand.hbm [shape: f32[2,1,8,128], index: 4, kind: input, shape index: {}]   ;;  %s1612_s5 = inlined_call_operand.hbm [shape: f32[2,8,128], index: 5, kind: output, shape index: {0}]   ;;  %s1613_s6 = inlined_call_operand.hbm [shape: f32[2,8,128], index: 6, kind: output, shape index: {1}]   ;;  %s1614_s7 = inlined_call_operand.hbm [shape: f32[2,8,128], index: 7, kind: output, shape index: {2}]  }
   0x1   :  { %1628 = sst [smem:[#allocation28_spill]] %s1607_s0 }
   0x2   :  { %1629 = sst [smem:[#allocation29_spill]] %s1608_s1 }
   0x3   :  { %1630 = sst [smem:[#allocation30_spill]] %s1610_s3 }
   0x4   :  { %1631 = sst [smem:[#allocation31_spill]] %s1612_s5 }
   0x5   :  { %1632 = sst [smem:[#allocation32_spill]] %s1613_s6 }
   0x6   :  { %1633 = sst [smem:[#allocation33_spill]] %s1614_s7 }
   0x7   :  { %13 = vsyncpa [#allocation3], 0 }
   0x8   :  { %15 = vsyncpa [#allocation3 + $0x1], 0 }
   0x9   :  { %16 = vsyncpa [#allocation6], 0 }
   0xa   :  { %18 = vsyncpa [#allocation6 + $0x1], 0 }
   0xb   :  { %19 = vsyncpa [#allocation9], 0 }
   0xc   :  { %21 = vsyncpa [#allocation9 + $0x1], 0 }
   0xd   :  { %22 = vsyncpa [#allocation4], 0 }
   0xe   :  { %24 = vsyncpa [#allocation4 + $0x1], 0 }
   0xf   :  { %25 = vsyncpa [#allocation13], 0 }
  0x10   :  { %27 = vsyncpa [#allocation13 + $0x1], 0  ;;  %s1334_s24 = smov 0   ;;  %s1336_s25 = smov 0  }
  0x11   :  { %s1338_s26 = smov 0   ;;  %s1340_s27 = smov 0  }
  0x12   :  { %s1342_s28 = smov 0   ;;  %s1344_s29 = smov 0  }
  0x13 LB: > { %1634 = sst [smem:[#allocation20_spill]] %s1270_s24  ;;  %s1365_s30 = sadd.s32 4294967295, %s1290_s29   ;;  %s1290_s29 = sphi %s1344_s29, %s33_s29   ;;  %s1286_s28 = sphi %s1342_s28, %s1664_s28   ;;  %s1282_s27 = sphi %s1340_s27, %s1667_s27   ;;  %s1278_s26 = sphi %s1338_s26, %s1662_s26   ;;  %s1274_s25 = sphi %s1336_s25, %s1666_s25   ;;  %s1270_s24 = sphi %s1334_s24, %s1665_s24  }
  0x14   : > { %1635 = sst [smem:[#allocation21_spill]] %s1278_s26  ;;  %s1615_s8 = sadd.s32 4294967294, %s1290_s29  }
  0x15   : > { %1636 = sst [smem:[#allocation22_spill]] %s1286_s28  ;;  %s45_s9 = sadd.s32 1, %s1286_s28 }
  0x16   : > { %1637 = sst [smem:[#allocation23_spill]] %s1290_s29  ;;  %s54_s10 = sadd.s32 1, %s1278_s26 }
  0x17   : > { %p47_p0 = scmp.ge.s32.totalorder %s45_s9, 2  ;;  %p61_p1 = scmp.ne.s32.totalorder %s1278_s26, %s1274_s25 }
  0x18   : > { %p62_p2 = scmp.eq.s32.totalorder %s1290_s29, 0  ;;  %p67_p3 = scmp.ne.s32.totalorder %s1274_s25, %s1270_s24 }
  0x19   : > { %s1669_s9 = smov (%p47_p0, %s45_s9), 0  ;;  %p68_p5 = scmp.eq.s32.totalorder %s1365_s30, 0 }
  0x1a   : > { %1638 = sst [smem:[#allocation24_spill]] %s1669_s9  ;;  %p1377_p4 = por %p62_p2, %p61_p1 }
  0x1b   : > { %s49_s12 = ssub.s32 %s1286_s28, %s1669_s9  ;;  %p203_p6 = scmp.eq.s32.totalorder %s1365_s30, 1 }
  0x1c   : > { %p52_p7 = scmp.eq.s32.totalorder %s49_s12, 0  ;;  %p1385_p8 = por %p68_p5, %p67_p3 }
  0x1d   : > { %p1389_p9 = por %p203_p6, %p61_p1  ;;  %p209_p10 = scmp.eq.s32.totalorder %s1615_s8, 1 }
  0x1e   : > { %s1396_s15 = scalar_select %p52_p7, %s1278_s26, %s54_s10  }
  0x1f   : > { %s1641_s14 = scalar_select %p1389_p9, 1, 0 }
  0x20   : > { %1643 = sst [smem:[#allocation26_spill]] %s1396_s15  ;;  %p1398_p11 = por %p209_p10, %p67_p3 }
  0x21   : > { %1642 = sst [smem:[#allocation25_spill]] %s1641_s14  ;;  %p861_p12 = scmp.ge.s32.totalorder %s1290_s29, 2 }
  0x22   : > { %s1644_s16 = scalar_select %p1398_p11, 1, 0 }
  0x23   : > { %p933_p13 = scmp.lt.s32.totalorder %s1290_s29, 2  ;;  %s1405_s17 = sand.u32 1, %s1278_s26  }
  0x24   : > { %1645 = sst [smem:[#allocation27_spill]] %s1644_s16  ;;  %s1408_s18 = sshll.u32 %s1405_s17, 3 }
  0x25   : > { %s1411_s19 = sshll.u32 %s1286_s28, 3  ;;  %p1415_p0 = pnand %p933_p13, %p1377_p4 }
  0x26   : > { %s301_s21 = sand.u32 1, %s1290_s29   ;;  %s1647_s1 = sld [smem:[#allocation29_spill]] }
  0x27   : > { %s305_s8 = scalar_lea.vmem [#allocation5], %s1408_s18  ;;  %s1425_s15 = scalar_lea.sflag [#allocation6], %s301_s21 }
  0x28   : > { %s314_s9 = sshll.u32 %s305_s8, 4  ;;  %s886_s11 = smul.u32 24, %s1405_s17  ;;  %s315_s9 = int_to_ptr.vmem [resolvable:$true] %s314_s9 }
  0x29   : > { %p870_p1 = scmp.ge.s32.totalorder %s1290_s29, 1  ;;  %p385_p2 = scmp.lt.s32.totalorder %s1290_s29, 3 }
  0x2a   : > { %s887_s26 = smul.u32 24, %s1286_s28  ;;  %s1649_s3 = sld [smem:[#allocation30_spill]] }
  0x2b   : > { %p1434_p3 = pnand %p870_p1, %p385_p2  ;;  %s348_s16 = scalar_lea.vmem [#allocation8], %s886_s11 }
  0x2c   : > { %s310_s10 = scalar_lea.hbm %s1647_s1, %s1411_s19  ;;  %s357_s24 = sshll.u32 %s348_s16, 4  ;;  %s358_s24 = int_to_ptr.vmem [resolvable:$true] %s357_s24 }
  0x2d   : > { %s312_s12 = sshll.u32 %s310_s10, 4  ;;  %s1293_s7 = smov 8   ;;  %s313_s12 = int_to_ptr.hbm [resolvable:$true] %s312_s12 }
  0x2e   : > { %913 = dma.hbm_to_vmem [thread:$0]  (!%p1415_p0), %s313_s12, 128, %s315_s9, %s1425_s15  }
  0x2f   : > { %s345_s9 = scalar_lea.sflag [#allocation9], %s301_s21  ;;  %s1292_s12 = smov 128  }
  0x30   : > { %s354_s10 = scalar_lea.hbm %s1649_s3, %s887_s26  ;;  %s1650_s0 = sld [smem:[#allocation28_spill]] }
  0x31   : > { %s355_s1 = sshll.u32 %s354_s10, 4  ;;  %s285_s8 = scalar_lea.vmem [#allocation2], %s1408_s18  ;;  %s356_s1 = int_to_ptr.hbm [resolvable:$true] %s355_s1 }
  0x32   : > { %919 = dma.hbm_to_vmem [thread:$0]  (!%p1415_p0), %s356_s1, 384, %s358_s24, %s345_s9, %s1292_s12, %s1292_s12, %s1293_s7  }
  0x33   : > { %s294_s10 = sshll.u32 %s285_s8, 4  ;;  %s282_s16 = scalar_lea.sflag [#allocation3], %s1405_s17  ;;  %s295_s10 = int_to_ptr.vmem [resolvable:$true] %s294_s10 }
  0x34   : > { %s331_s14 = scalar_lea.hbm %s1609_s2, %s887_s26  ;;  %s325_s1 = scalar_lea.vmem [#allocation7], %s886_s11 }
  0x35   : > { %s334_s24 = sshll.u32 %s325_s1, 4  ;;  %s332_s5 = sshll.u32 %s331_s14, 4  ;;  %s335_s24 = int_to_ptr.vmem [resolvable:$true] %s334_s24  ;;  %s333_s5 = int_to_ptr.hbm [resolvable:$true] %s332_s5 }
  0x36   : > { %s290_s23 = scalar_lea.hbm %s1650_s0, %s1411_s19  ;;  %s371_s8 = scalar_lea.vmem [#allocation10], %s1408_s18 }
  0x37   : > { %s292_s3 = sshll.u32 %s290_s23, 4  ;;  %s376_s23 = scalar_lea.hbm %s1611_s4, %s1411_s19  ;;  %s293_s3 = int_to_ptr.hbm [resolvable:$true] %s292_s3 }
  0x38   : > { %910 = dma.hbm_to_vmem [thread:$0]  (!%p1415_p0), %s293_s3, 128, %s295_s10, %s282_s16  }
  0x39   : > { %916 = dma.hbm_to_vmem [thread:$0]  (!%p1415_p0), %s333_s5, 384, %s335_s24, %s1425_s15, %s1292_s12, %s1292_s12, %s1293_s7  }
  0x3a   : > { %s380_s0 = sshll.u32 %s371_s8, 4  ;;  %s378_s17 = sshll.u32 %s376_s23, 4  ;;  %s381_s0 = int_to_ptr.vmem [resolvable:$true] %s380_s0  ;;  %s379_s17 = int_to_ptr.hbm [resolvable:$true] %s378_s17 }
  0x3b   : > { %922 = dma.hbm_to_vmem [thread:$0]  (!%p1415_p0), %s379_s17, 128, %s381_s0, %s345_s9  }
  0x3c   : > { %389 = sbr.rel (%p1434_p3) target bundleno = 135 (0x87), region = 40  ;;  %s1467_s3 = sand.u32 (!%p1434_p3), 1, %s1274_s25  }
  0x3d   : > { %s1470_s5 = sshll.u32 (!%p1434_p3), %s1467_s3, 3  ;;  %s392_s6 = scalar_lea.sflag (!%p1434_p3), [#allocation3], %s1467_s3 }
  0x3e   : > { %s395_s7 = scalar_lea.vmem (!%p1434_p3), [#allocation2], %s1470_s5 }
  0x41   : > { %1249 = dma.done.wait (%p1385_p8), %s392_s6, 128  }
  0x42   : > { %1251 = vsyncadd (%p1385_p8), %s392_s6, 4294967168  ;;  %s1479_s0 = sand.u32 1, %s1365_s30   ;;  %s405_s14 = scalar_lea.vmem [#allocation5], %s1470_s5 }
  0x43   : > { %s402_s26 = scalar_lea.sflag [#allocation6], %s1479_s0 }
  0x44   : > { %1253 = dma.done.wait (%p1385_p8), %s402_s26, 512  }
  0x45   : > { %1255 = vsyncadd (%p1385_p8), %s402_s26, 4294966784  ;;  %s890_s15 = smul.u32 24, %s1467_s3  ;;  %s422_s19 = scalar_lea.sflag [#allocation9], %s1479_s0 }
  0x47   : > { %s415_s18 = scalar_lea.vmem [#allocation7], %s890_s15  ;;  %s425_s20 = scalar_lea.vmem [#allocation8], %s890_s15 }
  0x48   : > { %1257 = dma.done.wait (%p1385_p8), %s422_s19, 512  }
  0x49   : > { %1259 = vsyncadd (%p1385_p8), %s422_s19, 4294966784  ;;  %v517_v0 = vld [vmem:[%s415_s18] sm:$0xff]  ;;  %v518_v1 = vld [vmem:[%s415_s18 + $0x8] sm:$0xff]  ;;  %s435_s30 = scalar_lea.vmem [#allocation10], %s1470_s5  ;;  %s496_s13 = scalar_lea.vmem [#allocation14], %s1470_s5 }
  0x4a   : > { %v519_v2 = vld [vmem:[%s415_s18 + $0x10] sm:$0xff]  ;;  %v524_v3 = vmul.f32 %v517_v0, %v517_v0  ;;  %v525_v4 = vmul.f32 %v518_v1, %v518_v1  ;;  %v521_v14 = vld [vmem:[%s425_s20 + $0x8] sm:$0xff]  ;;  %s1506_s11 = sshll.u32 %s1282_s27, 3  ;;  %v522_v21 = vld [vmem:[%s425_s20 + $0x10] sm:$0xff]  ;;  %s1651_s12 = sld [smem:[#allocation31_spill]] }
  0x4b   : > { %v526_v5 = vmul.f32 %v519_v2, %v519_v2  ;;  %v505_v6 = vld [vmem:[%s405_s14] sm:$0xff]  ;;  %v1496_v11 = vld [vmem:[%s435_s30] sm:$0xff]  ;;  %v530_v20 = vmul.f32 %v521_v14, %v518_v1  ;;  %v531_v27 = vmul.f32 %v522_v21, %v519_v2  ;;  %s482_s27 = scalar_lea.vmem [#allocation11], %s1470_s5  ;;  %v535_v34 = vmul.f32 %v521_v14, %v521_v14  ;;  %s571_s24 = scalar_lea.sflag [#allocation4], %s1467_s3 }
  0x4c   : > { %v527_v7 = vadd.f32 %v525_v4, %v524_v3  ;;  %v506_v8 = vmax.f32 %v505_v6, 0.001  ;;  %569 = vst [vmem:[%s496_s13] sm:$0xff] %v1496_v11  ;;  %v520_v13 = vld [vmem:[%s425_s20] sm:$0xff]  ;;  %s1517_s16 = sshll.u32 %s482_s27, 4  ;;  %v536_v39 = vmul.f32 %v522_v21, %v522_v21  ;;  %s594_s16 = int_to_ptr.vmem [resolvable:$true] %s1517_s16 }
  0x4d   : > { %v504_v16 = vld [vmem:[%s395_s7] sm:$0xff]  ;;  %v529_v19 = vmul.f32 %v520_v13, %v517_v0  ;;  %v534_v33 = vmul.f32 %v520_v13, %v520_v13 }
  0x4e   : > { %v1493_v9 = vadd.f32 %v527_v7, %v526_v5  ;;  %v507_v10 = vmin.f32 %v506_v8, 10.0 }
  0x4f   : > { %v532_v28 = vadd.f32 %v530_v20, %v529_v19  ;;  %v537_v40 = vadd.f32 %v535_v34, %v534_v33 }
  0x50   : > { %v539_v12 = vmax.f32 %v1493_v9, 1e-10  ;;  %986 = vlog2.f32 %v507_v10  ;;  %s591_s10 = scalar_lea.hbm %s1651_s12, %s1506_s11  ;;  %s1160_s17 = scalar_lea.hbm %s1651_s12, 16 }
  0x51   : > { %s1519_s21 = sshll.u32 %s591_s10, 4  ;;  %v533_v37 = vadd.f32 %v532_v28, %v531_v27  ;;  %s596_s21 = int_to_ptr.hbm [resolvable:$true] %s1519_s21 }
  0x52   : > { %988 = vrsqrt.f32 %v539_v12  ;;  %vm546_vm0 = vweird.f32 %v539_v12  ;;  %s1154_s28 = sshra.s32 %s596_s21, 4  ;;  %s1155_s28 = int_to_ptr.hbm [resolvable:$true] %s1154_s28 }
  0x53   : > { %s1156_s29 = scalar_lea.hbm %s1155_s28, 8  ;;  %p1161_p7 = scmp.lt.s32.totalorder %s1155_s28, %s1651_s12 }
  0x54   : > { %p1157_p4 = scmp.ne.s32.totalorder %s1155_s28, %s1156_s29  ;;  %p1162_p8 = scmp.lt.s32.totalorder %s1160_s17, %s1156_s29 }
  0x56   : > { %v987_v15 = vpop.eup %986  ;;  %p1158_p5 = pnand %p1157_p4, %p1389_p9  ;;  %p1163_p10 = por %p1162_p8, %p1161_p7 }
  0x57   : > { %v509_v17 = vmul.f32 0.6931472, %v987_v15 }
  0x58   : > { %v989_v18 = vpop.eup %988  ;;  %p1159_p6 = pneg %p1158_p5 }
  0x59   : > { %v541_v22 = vmul.f32 %v989_v18, %v539_v12  ;;  %v510_v23 = vsub.f32 %v504_v16, %v509_v17  ;;  %vm547_vm1 = vweird.f32 %v989_v18 }
  0x5a   : > { %vm548_vm3 = vmor %vm546_vm0, %vm547_vm1  ;;  %p1164_p13 = pnand %p1163_p10, %p1159_p6 }
  0x5b   : > { %v542_v24 = vmul.f32 %v989_v18, %v541_v22  ;;  %v511_v25 = vand.u32 2147483647, %v510_v23  ;;  %v513_v26 = vmul.f32 0.5, %v510_v23 }
  0x5d   : > { %v543_v29 = vmul.f32 0.5, %v542_v24  ;;  %vm1512_vm2 = vcmp.lt.f32.partialorder %v511_v25, 1.0  ;;  %v514_v31 = vmul.f32 %v513_v26, %v510_v23  ;;  %v877_v32 = vadd.f32 -0.5, %v511_v25 }
  0x5f   : > { %v544_v35 = vsub.f32 1.5, %v543_v29  ;;  %v516_v36 = vsel %vm1512_vm2, %v514_v31, %v877_v32 }
  0x60   : > { %561 = vst [vmem:[%s482_s27] sm:$0xff] %v516_v36 }
  0x61   : > { %v545_v38 = vmul.f32 %v989_v18, %v544_v35 }
  0x63   : > { %v549_v41 = vsel %vm548_vm3, %v989_v18, %v545_v38 }
  0x64   : > { %1167 = shalt.err (!%p1164_p13)
}
  0x65   : > { %901 = dma.vmem_to_hbm [thread:$0]  (%p1389_p9), %s594_s16, 128, %s596_s21, %s571_s24   ;;  %v550_v42 = vmul.f32 %v549_v41, %v1493_v9  ;;  %v554_v43 = vmul.f32 %v549_v41, %v533_v37  ;;  %v538_v44 = vadd.f32 %v537_v40, %v536_v39 }
  0x66   : > { %s1655_s14 = sld [smem:[#allocation32_spill]]  ;;  %s489_s22 = scalar_lea.vmem [#allocation12], %s1470_s5 }
  0x67   : > { %v551_v45 = vmul.f32 %v550_v42, %v549_v41  ;;  %v555_v47 = vmul.f32 3.0, %v554_v43  ;;  %s1656_s20 = sld [smem:[#allocation33_spill]]  ;;  %s607_s9 = sshll.u32 %s489_s22, 4  ;;  %s608_s9 = int_to_ptr.vmem [resolvable:$true] %s607_s9 }
  0x68   : > { %s1548_s27 = sshll.u32 %s496_s13, 4  ;;  %s622_s27 = int_to_ptr.vmem [resolvable:$true] %s1548_s27 }
  0x69   : > { %v552_v46 = vadd.f32 1.0, %v551_v45 }
  0x6b   : > { %v553_v48 = vadd.f32 %v552_v46, %v538_v44 }
  0x6c   : > { %s605_s15 = scalar_lea.hbm %s1655_s14, %s1506_s11  ;;  %s1188_s28 = scalar_lea.hbm %s1655_s14, 16 }
  0x6d   : > { %s619_s30 = scalar_lea.hbm %s1656_s20, %s1506_s11  ;;  %v556_v49 = vsub.f32 %v553_v48, %v555_v47  ;;  %s609_s10 = sshll.u32 %s605_s15, 4  ;;  %s610_s10 = int_to_ptr.hbm [resolvable:$true] %s609_s10 }
  0x6e   : > { %s1551_s16 = sshll.u32 %s619_s30, 4  ;;  %s576_s11 = scalar_lea.sflag [#allocation13], %s1479_s0  ;;  %s624_s16 = int_to_ptr.hbm [resolvable:$true] %s1551_s16 }
  0x6f   : > { %v557_v50 = vmul.f32 %v556_v49, %v1496_v11  ;;  %s1182_s21 = sshra.s32 %s610_s10, 4  ;;  %s1183_s21 = int_to_ptr.hbm [resolvable:$true] %s1182_s21 }
  0x70   : > { %s1184_s24 = scalar_lea.hbm %s1183_s21, 8  ;;  %p1189_p3 = scmp.lt.s32.totalorder %s1183_s21, %s1655_s14 }
  0x71   : > { %565 = vst [vmem:[%s489_s22] sm:$0xff] %v557_v50  ;;  %p1185_p0 = scmp.ne.s32.totalorder %s1183_s21, %s1184_s24  ;;  %p1190_p4 = scmp.lt.s32.totalorder %s1188_s28, %s1184_s24 }
  0x73   : > { %p1186_p1 = pnand %p1185_p0, %p1389_p9  ;;  %p1191_p5 = por %p1190_p4, %p1189_p3 }
  0x75   : > { %p1187_p2 = pneg %p1186_p1 }
  0x77   : > { %p1192_p6 = pnand %p1191_p5, %p1187_p2 }
  0x79   : > { %1195 = shalt.err (!%p1192_p6)
}
  0x7a   : > { %902 = dma.vmem_to_hbm [thread:$0]  (%p1389_p9), %s608_s9, 128, %s610_s10, %s576_s11  }
  0x7b   : > { %s1210_s0 = sshra.s32 %s624_s16, 4  ;;  %s1216_s7 = scalar_lea.hbm %s1656_s20, 16  ;;  %s1211_s0 = int_to_ptr.hbm [resolvable:$true] %s1210_s0 }
  0x7c   : > { %s1212_s8 = scalar_lea.hbm %s1211_s0, 8  ;;  %p1217_p13 = scmp.lt.s32.totalorder %s1211_s0, %s1656_s20 }
  0x7d   : > { %p1213_p7 = scmp.ne.s32.totalorder %s1211_s0, %s1212_s8  ;;  %p1218_p0 = scmp.lt.s32.totalorder %s1216_s7, %s1212_s8 }
  0x7f   : > { %p1214_p8 = pnand %p1213_p7, %p1389_p9  ;;  %p1219_p1 = por %p1218_p0, %p1217_p13 }
  0x81   : > { %p1215_p10 = pneg %p1214_p8 }
  0x83   : > { %p1220_p2 = pnand %p1219_p1, %p1215_p10 }
  0x85   : > { %1223 = shalt.err (!%p1220_p2)
}
  0x86   : > { %903 = dma.vmem_to_hbm [thread:$0]  (%p1389_p9), %s622_s27, 128, %s624_s16, %s576_s11  }
  0x87 PF: > { %s1657_s15 = sld [smem:[#allocation20_spill]]  ;;  %p924_p3 = pnand %p861_p12, %p1398_p11 }
  0x88   : > { %s1659_s19 = sld [smem:[#allocation23_spill]] }
  0x89   : > { %p925_p4 = pneg %p924_p3 }
  0x8d   : > { %s635_s30 = sand.u32 1, %s1657_s15  }
  0x8e   : > { %s636_s22 = scalar_lea.sflag [#allocation4], %s635_s30 }
  0x8f   : > { %1261 = dma.done.wait (%p925_p4), %s636_s22, 128  }
  0x90   : > { %1263 = vsyncadd (%p925_p4), %s636_s22, 4294967168  ;;  %s1660_s9 = sadd.s32 4294967294, %s1659_s19  }
  0x91   : > { %s645_s1 = sand.u32 1, %s1660_s9  }
  0x92   : > { %s646_s10 = scalar_lea.sflag [#allocation13], %s645_s1 }
  0x93   : > { %1265 = dma.done.wait (%p925_p4), %s646_s10, 256  }
  0x94   : > { %1267 = vsyncadd (%p925_p4), %s646_s10, 4294967040  ;;  %s33_s29 = sadd.s32 1, %s1659_s19   ;;  %s1661_s27 = sld [smem:[#allocation21_spill]] }
  0x95   : > { %p30_p9 = scmp.ge.s32.totalorder %s33_s29, 4   ;;  %s1662_s26 = sld [smem:[#allocation26_spill]] }
  0x96   : > { %s1663_s16 = sld [smem:[#allocation22_spill]]  ;;  %s1665_s24 = smov %s1274_s25 }
  0x97   : > { %s1664_s28 = sld [smem:[#allocation24_spill]] }
  0x98   :  { %32 = sbr.rel (!%p30_p9) target bundleno = 19 (0x13), region = 169 }
  0x9a   : > { %s1666_s25 = smov %s1661_s27 }
  0x9c   : > { %s1667_s27 = smov %s1663_s16 }
  0x9d   :  { %662 = vsyncpa [#allocation3], 1 }
  0x9e   :  { %664 = vsyncpa [#allocation3 + $0x1], 1 }
  0x9f   :  { %665 = vsyncpa [#allocation6], 1 }
  0xa0   :  { %667 = vsyncpa [#allocation6 + $0x1], 1 }
  0xa1   :  { %668 = vsyncpa [#allocation9], 1 }
  0xa2   :  { %670 = vsyncpa [#allocation9 + $0x1], 1 }
  0xa3   :  { %671 = vsyncpa [#allocation4], 1 }
  0xa4   :  { %673 = vsyncpa [#allocation4 + $0x1], 1 }
  0xa5   :  { %674 = vsyncpa [#allocation13], 1 }
  0xa6   :  { %676 = vsyncpa [#allocation13 + $0x1], 1 }

</bundles_post_ra>
